<compile_context>
chip_gen: v7x
topology: tpu7x:2x2x1
jax: 0.10.0
libtpu: 0.0.40
codegen_flags: <defaults>
</compile_context>

<pallas_src>
import functools
import math

import jax
import jax.numpy as jnp
from jax import lax
from jax.experimental import pallas as pl
from jax.experimental.pallas import tpu as pltpu

LN_EPS = 1e-5


# --------------------------------------------------------------------------- #
# helpers
# --------------------------------------------------------------------------- #

@functools.lru_cache(maxsize=None)
def _vmem_limit_bytes():
    cap = 128 * 1024 * 1024
    try:
        cap = int(pltpu.get_tpu_info().vmem_capacity_bytes)
    except Exception:
        pass
    # ~96-100 MiB on 128 MiB parts (v5e/v6e), ~48 MiB on 64 MiB parts (v7x).
    return max(32 * 1024 * 1024, min(100 * 1024 * 1024, cap * 3 // 4))


def _compiler_params(dimension_semantics):
    return pltpu.CompilerParams(dimension_semantics=dimension_semantics,
                                vmem_limit_bytes=_vmem_limit_bytes())


def _pick_tile(dim, candidates):
    for c in candidates:
        if dim % c == 0:
            return c
    return dim  # fall back to the full dimension (always a legal block)


def _token_tile(m):
    return _pick_tile(m, (256, 128, 64, 32, 16, 8))


def _seq_tile(t):
    return _pick_tile(t, (128, 256, 64, 32, 16, 8))


def _lane_tile(n, candidates=(512, 384, 256, 128)):
    return _pick_tile(n, candidates)


def _const_spec(shape):
    """Grid-constant block: resident across the grid, single-buffered."""
    return pl.BlockSpec(shape, lambda *_: (0,) * len(shape),
                        pipeline_mode=pl.Buffered(1))


def _layer_norm_f32(x_f32, gamma_f32, beta_f32):
    mean = jnp.mean(x_f32, axis=-1, keepdims=True)
    var = jnp.mean(jnp.square(x_f32 - mean), axis=-1, keepdims=True)
    return (x_f32 - mean) * lax.rsqrt(var + LN_EPS) * gamma_f32 + beta_f32


# --------------------------------------------------------------------------- #
# kernel 1: ln_1 -> c_attn   (tokens x output-column tiling)
# --------------------------------------------------------------------------- #

def ln_linear_kernel(x_ref, g_ref, b_ref, w_ref, bias_ref, o_ref):
    x = x_ref[...]
    h = _layer_norm_f32(x.astype(jnp.float32),
                        g_ref[...].astype(jnp.float32),
                        b_ref[...].astype(jnp.float32))
    h = h.astype(x.dtype)                              # MXU operand in act dtype
    out = jnp.dot(h, w_ref[...], preferred_element_type=jnp.float32)
    out = out + bias_ref[...].astype(jnp.float32)
    o_ref[...] = out.astype(o_ref.dtype)


def ln_linear_pallas(x, gamma, beta, w, b):
    M, D = x.shape
    O = w.shape[1]
    tm = _token_tile(M)
    tn = _lane_tile(O)
    isz = x.dtype.itemsize
    cost = pl.CostEstimate(flops=2 * M * D * O, transcendentals=M,
                           bytes_accessed=(2 * M * D + D * O + O + M * O) * isz)
    return pl.pallas_call(
        ln_linear_kernel,
        out_shape=jax.ShapeDtypeStruct((M, O), x.dtype),
        grid=(M // tm, O // tn),
        in_specs=[
            pl.BlockSpec((tm, D), lambda i, n: (i, 0)),   # resident across n
            _const_spec((1, D)),
            _const_spec((1, D)),
            pl.BlockSpec((D, tn), lambda i, n: (0, n)),   # streamed weight cols
            pl.BlockSpec((1, tn), lambda i, n: (0, n)),
        ],
        out_specs=pl.BlockSpec((tm, tn), lambda i, n: (i, n)),
        compiler_params=_compiler_params(("parallel", "parallel")),
        cost_estimate=cost,
    )(x, gamma.reshape(1, D), beta.reshape(1, D), w, b.reshape(1, O))


# --------------------------------------------------------------------------- #
# kernel 2: flash-style causal self-attention (all heads per step)
# --------------------------------------------------------------------------- #

def flash_attn_kernel(q_ref, k_ref, v_ref, o_ref, acc_ref, m_ref, l_ref, *,
                      n_head, head_dim, tq, tkv, scale):
    qi = pl.program_id(1)
    ki = pl.program_id(2)

    @pl.when(ki == 0)
    def _init():
        m_ref[...] = jnp.full_like(m_ref, -jnp.inf)
        l_ref[...] = jnp.zeros_like(l_ref)
        acc_ref[...] = jnp.zeros_like(acc_ref)

    # Causality: skip KV tiles lying strictly above the diagonal.
    @pl.when(ki * tkv <= qi * tq + (tq - 1))
    def _compute():
        q = q_ref[0]                      # (tq,  n_head*head_dim)
        k = k_ref[0]                      # (tkv, n_head*head_dim)
        v = v_ref[0]
        row = qi * tq + lax.broadcasted_iota(jnp.int32, (tq, tkv), 0)
        col = ki * tkv + lax.broadcasted_iota(jnp.int32, (tq, tkv), 1)
        causal = col <= row
        for h in range(n_head):
            sl = slice(h * head_dim, (h + 1) * head_dim)
            # QK^T contracting the last dims -> no transpose of K materialised.
            s = lax.dot_general(q[:, sl], k[:, sl], (((1,), (1,)), ((), ())),
                                preferred_element_type=jnp.float32)
            s = jnp.where(causal, s * scale, -jnp.inf)
            m_prev = m_ref[h]
            m_new = jnp.maximum(m_prev, jnp.max(s, axis=-1, keepdims=True))
            alpha = jnp.exp(m_prev - m_new)
            p = jnp.exp(s - m_new)                       # unnormalised probs
            l_ref[h] = alpha * l_ref[h] + jnp.sum(p, axis=-1, keepdims=True)
            acc_ref[h] = alpha * acc_ref[h] + jnp.dot(
                p.astype(v.dtype), v[:, sl], preferred_element_type=jnp.float32)
            m_ref[h] = m_new

    @pl.when(ki == pl.num_programs(2) - 1)
    def _finalize():
        # Deferred normalisation: one approx reciprocal per row/head (EUP),
        # followed by a single lane-dense (tq, C) store.
        outs = [acc_ref[h] * pl.reciprocal(l_ref[h], approx=True)
                for h in range(n_head)]
        o_ref[0] = jnp.concatenate(outs, axis=-1).astype(o_ref.dtype)


def causal_attention_pallas(qkv, B, T, C, n_head):
    """qkv: [B*T, 3C] from ln_1 -> c_attn.  Returns [B, T, C] (token-major)."""
    hd = C // n_head
    tq = _seq_tile(T)
    tkv = _seq_tile(T)
    qkv3 = qkv.reshape(B, T, 3 * C)

    if C % 128 == 0:
        # Read q/k/v column blocks straight out of the fused qkv tensor: no
        # split, no transpose, no extra HBM passes between pallas_calls.
        args = (qkv3, qkv3, qkv3)
        q_spec = pl.BlockSpec((1, tq, C), lambda b, qi, ki: (b, qi, 0))
        k_spec = pl.BlockSpec((1, tkv, C), lambda b, qi, ki: (b, ki, 1))
        v_spec = pl.BlockSpec((1, tkv, C), lambda b, qi, ki: (b, ki, 2))
    else:
        # Small-C fallback (e.g. the demo config): contiguous split (still no
        # transposes); q/k/v blocks then span the full last dim.
        q, k, v = jnp.split(qkv3, 3, axis=-1)
        args = (q, k, v)
        q_spec = pl.BlockSpec((1, tq, C), lambda b, qi, ki: (b, qi, 0))
        k_spec = pl.BlockSpec((1, tkv, C), lambda b, qi, ki: (b, ki, 0))
        v_spec = pl.BlockSpec((1, tkv, C), lambda b, qi, ki: (b, ki, 0))

    isz = qkv.dtype.itemsize
    cost = pl.CostEstimate(
        flops=2 * B * n_head * T * T * hd,         # causal ~halves the dense 4x
        transcendentals=B * n_head * T * T // 2,
        bytes_accessed=4 * B * T * C * isz)

    kernel = functools.partial(flash_attn_kernel, n_head=n_head, head_dim=hd,
                               tq=tq, tkv=tkv, scale=1.0 / math.sqrt(hd))
    return pl.pallas_call(
        kernel,
        out_shape=jax.ShapeDtypeStruct((B, T, C), qkv.dtype),
        grid=(B, T // tq, T // tkv),
        in_specs=[q_spec, k_spec, v_spec],
        out_specs=pl.BlockSpec((1, tq, C), lambda b, qi, ki: (b, qi, 0)),
        scratch_shapes=[
            pltpu.VMEM((n_head, tq, hd), jnp.float32),   # output accumulator
            pltpu.VMEM((n_head, tq, 1), jnp.float32),    # running max
            pltpu.VMEM((n_head, tq, 1), jnp.float32),    # running sum
        ],
        compiler_params=_compiler_params(("parallel", "parallel", "arbitrary")),
        cost_estimate=cost,
    )(*args)


# --------------------------------------------------------------------------- #
# kernel 3: c_proj + first residual
# --------------------------------------------------------------------------- #

def proj_residual_kernel(y_ref, w_ref, b_ref, res_ref, o_ref):
    out = jnp.dot(y_ref[...], w_ref[...], preferred_element_type=jnp.float32)
    out = out + b_ref[...].astype(jnp.float32) + res_ref[...].astype(jnp.float32)
    o_ref[...] = out.astype(o_ref.dtype)


def proj_residual_pallas(y, w, b, residual):
    M, D = y.shape
    O = w.shape[1]
    tm = _token_tile(M)
    isz = y.dtype.itemsize
    cost = pl.CostEstimate(flops=2 * M * D * O, transcendentals=0,
                           bytes_accessed=(M * D + D * O + O + 2 * M * O) * isz)
    return pl.pallas_call(
        proj_residual_kernel,
        out_shape=jax.ShapeDtypeStruct((M, O), residual.dtype),
        grid=(M // tm,),
        in_specs=[
            pl.BlockSpec((tm, D), lambda i: (i, 0)),
            _const_spec((D, O)),
            _const_spec((1, O)),
            pl.BlockSpec((tm, O), lambda i: (i, 0)),
        ],
        out_specs=pl.BlockSpec((tm, O), lambda i: (i, 0)),
        input_output_aliases={3: 0},             # residual buffer -> output
        compiler_params=_compiler_params(("parallel",)),
        cost_estimate=cost,
    )(y, w, b.reshape(1, O), residual)


# --------------------------------------------------------------------------- #
# kernel 4: ln_2 -> c_fc -> GELU(tanh) -> c_proj + residual, hidden-dim tiled
# --------------------------------------------------------------------------- #

def ln_mlp_residual_kernel(x_ref, g_ref, b_ref, w1_ref, b1_ref, w2_ref, b2_ref,
                           o_ref, acc_ref, ln_ref):
    j = pl.program_id(1)

    @pl.when(j == 0)
    def _init():
        acc_ref[...] = jnp.zeros_like(acc_ref)
        ln_ref[...] = _layer_norm_f32(
            x_ref[...].astype(jnp.float32),
            g_ref[...].astype(jnp.float32),
            b_ref[...].astype(jnp.float32)).astype(ln_ref.dtype)

    h = ln_ref[...]
    a = jnp.dot(h, w1_ref[...], preferred_element_type=jnp.float32)
    a = a + b1_ref[...].astype(jnp.float32)
    c = jnp.float32(math.sqrt(2.0 / math.pi))
    act = 0.5 * a * (1.0 + jnp.tanh(c * (a + 0.044715 * a * a * a)))
    acc_ref[...] += jnp.dot(act.astype(h.dtype), w2_ref[...],
                            preferred_element_type=jnp.float32)

    @pl.when(j == pl.num_programs(1) - 1)
    def _finalize():
        out = (acc_ref[...] + b2_ref[...].astype(jnp.float32)
               + x_ref[...].astype(jnp.float32))
        o_ref[...] = out.astype(o_ref.dtype)


def ln_mlp_residual_pallas(x, gamma, beta, w_fc, b_fc, w_pj, b_pj):
    M, D = x.shape
    H = w_fc.shape[1]
    tm = _token_tile(M)                       # <= 256: keeps f32 temps small
    th = _lane_tile(H, (512, 256, 128))
    isz = x.dtype.itemsize
    cost = pl.CostEstimate(flops=4 * M * D * H, transcendentals=M * H + M,
                           bytes_accessed=(3 * M * D + 2 * D * H + H + D) * isz)
    return pl.pallas_call(
        ln_mlp_residual_kernel,
        out_shape=jax.ShapeDtypeStruct((M, D), x.dtype),
        grid=(M // tm, H // th),
        in_specs=[
            pl.BlockSpec((tm, D), lambda i, j: (i, 0)),   # resident across j
            _const_spec((1, D)),
            _const_spec((1, D)),
            pl.BlockSpec((D, th), lambda i, j: (0, j)),   # c_fc weight stream
            pl.BlockSpec((1, th), lambda i, j: (0, j)),
            pl.BlockSpec((th, D), lambda i, j: (j, 0)),   # c_proj weight stream
            _const_spec((1, D)),
        ],
        out_specs=pl.BlockSpec((tm, D), lambda i, j: (i, 0)),
        scratch_shapes=[
            pltpu.VMEM((tm, D), jnp.float32),   # f32 accumulator over H tiles
            pltpu.VMEM((tm, D), x.dtype),       # cached LayerNorm(x) tile
        ],
        input_output_aliases={0: 0},            # x buffer reused for the output
        compiler_params=_compiler_params(("parallel", "arbitrary")),
        cost_estimate=cost,
    )(x, gamma.reshape(1, D), beta.reshape(1, D),
      w_fc, b_fc.reshape(1, H), w_pj, b_pj.reshape(1, D))


# --------------------------------------------------------------------------- #
# Block forward
# --------------------------------------------------------------------------- #

def block_forward(x, params):
    """x: [B, T, C].  Linear weights are stored [in, out] (PyTorch weight.T)."""
    B, T, C = x.shape
    nh = params["n_head"]
    assert C % nh == 0
    M = B * T
    x2d = x.reshape(M, C)

    # ln_1 -> c_attn (fused qkv projection).
    qkv = ln_linear_pallas(x2d, params["ln1_g"], params["ln1_b"],
                           params["w_attn"], params["b_attn"])        # [M, 3C]

    # Flash-style causal attention (token-major in and out, no transposes).
    y = causal_attention_pallas(qkv, B, T, C, nh)                     # [B, T, C]

    # c_proj + first residual.
    x2d = proj_residual_pallas(y.reshape(M, C), params["w_proj"],
                               params["b_proj"], x2d)

    # ln_2 -> c_fc -> GELU(tanh) -> c_proj + second residual.
    x2d = ln_mlp_residual_pallas(x2d, params["ln2_g"], params["ln2_b"],
                                 params["w_fc"], params["b_fc"],
                                 params["w_pj"], params["b_pj"])
    return x2d.reshape(B, T, C)


# --------------------------------------------------------------------------- #
# pure-JAX reference
# --------------------------------------------------------------------------- #

def reference_block(x, params):
    B, T, C = x.shape
    nh = params["n_head"]
    hd = C // nh

    def ln(v, g, b):
        v = v.astype(jnp.float32)
        mu = v.mean(-1, keepdims=True)
        var = ((v - mu) ** 2).mean(-1, keepdims=True)
        return (v - mu) / jnp.sqrt(var + LN_EPS) * g + b

    h = ln(x, params["ln1_g"], params["ln1_b"])
    qkv = h @ params["w_attn"] + params["b_attn"]
    q, k, v = jnp.split(qkv, 3, axis=-1)
    q = q.reshape(B, T, nh, hd).transpose(0, 2, 1, 3)
    k = k.reshape(B, T, nh, hd).transpose(0, 2, 1, 3)
    v = v.reshape(B, T, nh, hd).transpose(0, 2, 1, 3)
    s = jnp.einsum("bhqd,bhkd->bhqk", q, k) / math.sqrt(hd)
    mask = jnp.tril(jnp.ones((T, T), dtype=bool))
    s = jnp.where(mask, s, -jnp.inf)
    p = jax.nn.softmax(s, axis=-1)
    y = jnp.einsum("bhqk,bhkd->bhqd", p, v)
    y = y.transpose(0, 2, 1, 3).reshape(B, T, C)
    x = x + y @ params["w_proj"] + params["b_proj"]

    h2 = ln(x, params["ln2_g"], params["ln2_b"])
    a = h2 @ params["w_fc"] + params["b_fc"]
    c = math.sqrt(2.0 / math.pi)
    g = 0.5 * a * (1.0 + jnp.tanh(c * (a + 0.044715 * a ** 3)))
    x = x + g @ params["w_pj"] + params["b_pj"]
    return x


# --------------------------------------------------------------------------- #
# main
# --------------------------------------------------------------------------- #

if __name__ == "__main__":
    # Small config consistent with the module (hidden = 4 * n_embd).
    B, T, n_embd, n_head = 2, 8, 32, 4
    hidden = 4 * n_embd

    key = jax.random.PRNGKey(0)
    ks = jax.random.split(key, 13)

    def lin(k, fan_in, shape):
        return jax.random.normal(k, shape, dtype=jnp.float32) / jnp.sqrt(fan_in)

    x = jax.random.normal(ks[0], (B, T, n_embd), dtype=jnp.float32)
    params = dict(
        n_head=n_head,
        ln1_g=1.0 + 0.1 * jax.random.normal(ks[1], (n_embd,), dtype=jnp.float32),
        ln1_b=0.1 * jax.random.normal(ks[2], (n_embd,), dtype=jnp.float32),
        w_attn=lin(ks[3], n_embd, (n_embd, 3 * n_embd)),
        b_attn=0.01 * jax.random.normal(ks[4], (3 * n_embd,), dtype=jnp.float32),
        w_proj=lin(ks[5], n_embd, (n_embd, n_embd)),
        b_proj=0.01 * jax.random.normal(ks[6], (n_embd,), dtype=jnp.float32),
        ln2_g=1.0 + 0.1 * jax.random.normal(ks[7], (n_embd,), dtype=jnp.float32),
        ln2_b=0.1 * jax.random.normal(ks[8], (n_embd,), dtype=jnp.float32),
        w_fc=lin(ks[9], n_embd, (n_embd, hidden)),
        b_fc=0.01 * jax.random.normal(ks[10], (hidden,), dtype=jnp.float32),
        w_pj=lin(ks[11], hidden, (hidden, n_embd)),
        b_pj=0.01 * jax.random.normal(ks[12], (n_embd,), dtype=jnp.float32),
    )

    out = block_forward(x, params)
    jax.block_until_ready(out)

    ref = reference_block(x, params)
    err = float(jnp.max(jnp.abs(out - ref)))
    # Tolerance accounts for the approx-reciprocal softmax normalisation (EUP).
    assert jnp.allclose(out, ref, atol=1e-2, rtol=1e-2), \
        f"mismatch vs reference, max|diff|={err}"

    print("KERNEL_OK")
</pallas_src>

<mosaic_0001>
module attributes {stable_mosaic.version = 11 : i64} {
  func.func @ln_linear_kernel(%arg0: i32, %arg1: i32, %arg2: memref<16x32xf32, #tpu.memory_space<vmem>>, %arg3: memref<1x32xf32, #tpu.memory_space<vmem>>, %arg4: memref<1x32xf32, #tpu.memory_space<vmem>>, %arg5: memref<32x96xf32, #tpu.memory_space<vmem>>, %arg6: memref<1x96xf32, #tpu.memory_space<vmem>>, %arg7: memref<16x96xf32, #tpu.memory_space<vmem>>) attributes {dimension_semantics = [#tpu.dimension_semantics<parallel>, #tpu.dimension_semantics<parallel>], iteration_bounds = array<i64: 1, 1>, scalar_prefetch = 0 : i64, scratch_operands = 0 : i64, tpu.core_type = #tpu.core_type<tc>, window_params = [{transform_indices = @transform_0, window_bounds = array<i64: 16, 32>}, {pipeline_mode = #tpu.pipeline_mode<synchronous>, transform_indices = @transform_1, window_bounds = array<i64: 1, 32>}, {pipeline_mode = #tpu.pipeline_mode<synchronous>, transform_indices = @transform_2, window_bounds = array<i64: 1, 32>}, {transform_indices = @transform_3, window_bounds = array<i64: 32, 96>}, {transform_indices = @transform_4, window_bounds = array<i64: 1, 96>}, {transform_indices = @transform_5, window_bounds = array<i64: 16, 96>}]} {
    %c0 = arith.constant 0 : index
    %c0_0 = arith.constant 0 : index
    %0 = vector.load %arg2[%c0, %c0_0] : memref<16x32xf32, #tpu.memory_space<vmem>>, vector<16x32xf32>
    %c0_1 = arith.constant 0 : index
    %c0_2 = arith.constant 0 : index
    %1 = vector.load %arg3[%c0_1, %c0_2] : memref<1x32xf32, #tpu.memory_space<vmem>>, vector<1x32xf32>
    %c0_3 = arith.constant 0 : index
    %c0_4 = arith.constant 0 : index
    %2 = vector.load %arg4[%c0_3, %c0_4] : memref<1x32xf32, #tpu.memory_space<vmem>>, vector<1x32xf32>
    %cst = arith.constant dense<0.000000e+00> : vector<16xf32>
    %3 = vector.multi_reduction <add>, %0, %cst [1] : vector<16x32xf32> to vector<16xf32>
    %4 = vector.shape_cast %3 : vector<16xf32> to vector<16x1xf32>
    %cst_5 = arith.constant 3.200000e+01 : f32
    %5 = vector.broadcast %cst_5 : f32 to vector<16x1xf32>
    %6 = arith.divf %4, %5 : vector<16x1xf32>
    %7 = vector.broadcast %6 : vector<16x1xf32> to vector<16x32xf32>
    %8 = arith.subf %0, %7 : vector<16x32xf32>
    %9 = arith.mulf %8, %8 : vector<16x32xf32>
    %cst_6 = arith.constant dense<0.000000e+00> : vector<16xf32>
    %10 = vector.multi_reduction <add>, %9, %cst_6 [1] : vector<16x32xf32> to vector<16xf32>
    %11 = vector.shape_cast %10 : vector<16xf32> to vector<16x1xf32>
    %cst_7 = arith.constant 3.200000e+01 : f32
    %12 = vector.broadcast %cst_7 : f32 to vector<16x1xf32>
    %13 = arith.divf %11, %12 : vector<16x1xf32>
    %14 = vector.broadcast %6 : vector<16x1xf32> to vector<16x32xf32>
    %15 = arith.subf %0, %14 : vector<16x32xf32>
    %cst_8 = arith.constant 9.99999974E-6 : f32
    %16 = vector.broadcast %cst_8 : f32 to vector<16x1xf32>
    %17 = arith.addf %13, %16 : vector<16x1xf32>
    %18 = math.rsqrt %17 : vector<16x1xf32>
    %19 = vector.broadcast %18 : vector<16x1xf32> to vector<16x32xf32>
    %20 = arith.mulf %15, %19 : vector<16x32xf32>
    %21 = vector.broadcast %1 : vector<1x32xf32> to vector<16x32xf32>
    %22 = arith.mulf %20, %21 : vector<16x32xf32>
    %23 = vector.broadcast %2 : vector<1x32xf32> to vector<16x32xf32>
    %24 = arith.addf %22, %23 : vector<16x32xf32>
    %c0_9 = arith.constant 0 : index
    %c0_10 = arith.constant 0 : index
    %25 = vector.load %arg5[%c0_9, %c0_10] : memref<32x96xf32, #tpu.memory_space<vmem>>, vector<32x96xf32>
    %cst_11 = arith.constant dense<0.000000e+00> : vector<16x96xf32>
    %26 = tpu.matmul %24, %25, %cst_11 {dimension_numbers = #tpu.dot_dimension_numbers<[1], [0], [0], [1], [0, 0, 1, 1], [], []>} : vector<16x32xf32>, vector<32x96xf32>, vector<16x96xf32> -> vector<16x96xf32>
    %c0_12 = arith.constant 0 : index
    %c0_13 = arith.constant 0 : index
    %27 = vector.load %arg6[%c0_12, %c0_13] : memref<1x96xf32, #tpu.memory_space<vmem>>, vector<1x96xf32>
    %28 = vector.broadcast %27 : vector<1x96xf32> to vector<16x96xf32>
    %29 = arith.addf %26, %28 : vector<16x96xf32>
    %c0_14 = arith.constant 0 : index
    %c0_15 = arith.constant 0 : index
    %30 = vector.load %arg7[%c0_14, %c0_15] : memref<16x96xf32, #tpu.memory_space<vmem>>, vector<16x96xf32>
    tpu.vector_store %arg7[%c0_14, %c0_15], %29 {strides = array<i32>} : memref<16x96xf32, #tpu.memory_space<vmem>>, vector<16x96xf32>,
    return
  }
  func.func @transform_0(%arg0: i32, %arg1: i32) -> (i32, i32) {
    %c0_i32 = arith.constant 0 : i32
    %c0_i32_0 = arith.constant 0 : i32
    return %arg0, %c0_i32 : i32, i32
  }
  func.func @transform_1(%arg0: i32, %arg1: i32) -> (i32, i32) {
    %c0_i32 = arith.constant 0 : i32
    %c0_i32_0 = arith.constant 0 : i32
    %c0_i32_1 = arith.constant 0 : i32
    return %c0_i32, %c0_i32_0 : i32, i32
  }
  func.func @transform_2(%arg0: i32, %arg1: i32) -> (i32, i32) {
    %c0_i32 = arith.constant 0 : i32
    %c0_i32_0 = arith.constant 0 : i32
    %c0_i32_1 = arith.constant 0 : i32
    return %c0_i32, %c0_i32_0 : i32, i32
  }
  func.func @transform_3(%arg0: i32, %arg1: i32) -> (i32, i32) {
    %c0_i32 = arith.constant 0 : i32
    %c0_i32_0 = arith.constant 0 : i32
    return %c0_i32, %arg1 : i32, i32
  }
  func.func @transform_4(%arg0: i32, %arg1: i32) -> (i32, i32) {
    %c0_i32 = arith.constant 0 : i32
    %c0_i32_0 = arith.constant 0 : i32
    return %c0_i32, %arg1 : i32, i32
  }
  func.func @transform_5(%arg0: i32, %arg1: i32) -> (i32, i32) {
    %c0_i32 = arith.constant 0 : i32
    return %arg0, %arg1 : i32, i32
  }
}

</mosaic_0001>

<bundles_post_ra>
// kernel: tpu_custom_call.1
= control target key start
LH: loop header
LB: loop body
LE: loop exit
PB: predicated region body
PF: predicated region fallthrough
CT: control target
= control target key end

     0   :  { %10 = vsyncpa [#allocation3], 0  ;;  %s552_s0 = inlined_call_operand.hbm [shape: f32[16,32], index: 0, kind: input, shape index: {}]   ;;  %s553_s1 = inlined_call_operand.hbm [shape: f32[1,32], index: 1, kind: input, shape index: {}]   ;;  %s554_s2 = inlined_call_operand.hbm [shape: f32[1,32], index: 2, kind: input, shape index: {}]   ;;  %s555_s3 = inlined_call_operand.hbm [shape: f32[32,96], index: 3, kind: input, shape index: {}]   ;;  %s556_s4 = inlined_call_operand.hbm [shape: f32[1,96], index: 4, kind: input, shape index: {}]   ;;  %s557_s5 = inlined_call_operand.hbm [shape: f32[16,96], index: 5, kind: output, shape index: {}]  }
   0x1   :  { %11 = vsyncpa [#allocation6], 0 }
   0x2   :  { %12 = vsyncpa [#allocation9], 0 }
   0x3   :  { %13 = vsyncpa [#allocation4], 0  ;;  %s427_s18 = smov [#allocation5]   ;;  %s287_s22 = scalar_lea.hbm %s553_s1, 16 }
   0x4   :  { %s32_s19 = sshll.u32 %s427_s18, 4  ;;  %p288_p0 = scmp.ne.s32.totalorder %s553_s1, %s287_s22  ;;  %s33_s19 = int_to_ptr.vmem [resolvable:$true] %s32_s19 }
   0x5   :  { %p291_p1 = scmp.lt.u32.totalorder %s287_s22, %s553_s1 }
   0x7   :  { %p293_p2 = pnand %p291_p1, %p288_p0 }
   0x9   :  { %296 = shalt.err (!%p293_p2)
}
   0xa   :  { %s297_s27 = scalar_lea.vmem %s33_s19, 16  ;;  %s301_s28 = scalar_lea.vmem %s33_s19, 32 }
   0xb   :  { %p298_p3 = scmp.ne.s32.totalorder %s33_s19, %s297_s27  ;;  %p302_p4 = scmp.lt.s32.totalorder %s33_s19, %s33_s19 }
   0xc   :  { %p303_p5 = scmp.lt.s32.totalorder %s301_s28, %s297_s27 }
   0xe   :  { %p304_p6 = por %p303_p5, %p302_p4 }
  0x10   :  { %p305_p7 = pnand %p304_p6, %p298_p3 }
  0x12   :  { %308 = shalt.err (!%p305_p7)
}
  0x13   :  { %35 = dma.hbm_to_vmem [thread:$0]  %s553_s1, 16, %s33_s19, [#allocation6]  }
  0x14   :  { %s428_s6 = smov [#allocation8]   ;;  %s429_s8 = smov [#allocation2]  }
  0x15   :  { %s51_s7 = sshll.u32 %s428_s6, 4  ;;  %s19_s9 = sshll.u32 %s429_s8, 4  ;;  %s52_s7 = int_to_ptr.vmem [resolvable:$true] %s51_s7  ;;  %s20_s9 = int_to_ptr.vmem [resolvable:$true] %s19_s9 }
  0x16   :  { %s309_s12 = scalar_lea.hbm %s555_s3, 512 }
  0x17   :  { %p310_p8 = scmp.ne.s32.totalorder %s555_s3, %s309_s12  ;;  %p313_p9 = scmp.lt.u32.totalorder %s309_s12, %s555_s3 }
  0x19   :  { %p315_p10 = pnand %p313_p9, %p310_p8 }
  0x1b   :  { %318 = shalt.err (!%p315_p10)
}
  0x1c   :  { %s319_s1 = scalar_lea.vmem %s52_s7, 512  ;;  %p324_p12 = scmp.lt.s32.totalorder %s52_s7, %s52_s7 }
  0x1d   :  { %p320_p11 = scmp.ne.s32.totalorder %s52_s7, %s319_s1  ;;  %p325_p13 = scmp.lt.s32.totalorder %s319_s1, %s319_s1 }
  0x1f   :  { %p326_p0 = por %p325_p13, %p324_p12 }
  0x21   :  { %p327_p1 = pnand %p326_p0, %p320_p11 }
  0x23   :  { %330 = shalt.err (!%p327_p1)
}
  0x24   :  { %s430_s17 = smov 128   ;;  %s431_s18 = smov 8  }
  0x25   :  { %57 = dma.hbm_to_vmem [thread:$0]  %s555_s3, 512, %s52_s7, [#allocation9], %s430_s17, %s430_s17, %s431_s18  }
  0x26   :  { %s331_s23 = scalar_lea.hbm %s552_s0, 256 }
  0x27   :  { %p332_p2 = scmp.ne.s32.totalorder %s552_s0, %s331_s23  ;;  %p335_p3 = scmp.lt.u32.totalorder %s331_s23, %s552_s0 }
  0x29   :  { %p337_p4 = pnand %p335_p3, %p332_p2 }
  0x2b   :  { %340 = shalt.err (!%p337_p4)
}
  0x2c   :  { %s341_s28 = scalar_lea.vmem %s20_s9, 256  ;;  %p346_p6 = scmp.lt.s32.totalorder %s20_s9, %s20_s9 }
  0x2d   :  { %p342_p5 = scmp.ne.s32.totalorder %s20_s9, %s341_s28  ;;  %p347_p7 = scmp.lt.s32.totalorder %s341_s28, %s341_s28 }
  0x2f   :  { %p348_p8 = por %p347_p7, %p346_p6 }
  0x31   :  { %p349_p9 = pnand %p348_p8, %p342_p5 }
  0x33   :  { %352 = shalt.err (!%p349_p9)
}
  0x34   :  { %25 = dma.hbm_to_vmem [thread:$0]  %s552_s0, 256, %s20_s9, [#allocation3], %s430_s17, %s430_s17, %s431_s18  }
  0x35   :  { %s432_s30 = smov [#allocation7]   ;;  %s433_s7 = smov [#allocation10]  }
  0x36   :  { %s42_s6 = sshll.u32 %s432_s30, 4  ;;  %s64_s8 = sshll.u32 %s433_s7, 4  ;;  %s43_s6 = int_to_ptr.vmem [resolvable:$true] %s42_s6  ;;  %s65_s8 = int_to_ptr.vmem [resolvable:$true] %s64_s8 }
  0x37   :  { %s353_s12 = scalar_lea.hbm %s554_s2, 16 }
  0x38   :  { %p354_p10 = scmp.ne.s32.totalorder %s554_s2, %s353_s12  ;;  %p357_p11 = scmp.lt.u32.totalorder %s353_s12, %s554_s2 }
  0x3a   :  { %p359_p12 = pnand %p357_p11, %p354_p10 }
  0x3c   :  { %362 = shalt.err (!%p359_p12)
}
  0x3d   :  { %s363_s0 = scalar_lea.vmem %s43_s6, 16  ;;  %s367_s9 = scalar_lea.vmem %s43_s6, 32 }
  0x3e   :  { %p364_p13 = scmp.ne.s32.totalorder %s43_s6, %s363_s0  ;;  %p368_p0 = scmp.lt.s32.totalorder %s43_s6, %s43_s6 }
  0x3f   :  { %p369_p1 = scmp.lt.s32.totalorder %s367_s9, %s363_s0 }
  0x41   :  { %p370_p2 = por %p369_p1, %p368_p0 }
  0x43   :  { %p371_p3 = pnand %p370_p2, %p364_p13 }
  0x45   :  { %374 = shalt.err (!%p371_p3)
}
  0x46   :  { %45 = dma.hbm_to_vmem [thread:$0]  %s554_s2, 16, %s43_s6, [#allocation6]  }
  0x47   :  { %s375_s22 = scalar_lea.hbm %s556_s4, 16 }
  0x48   :  { %p376_p4 = scmp.ne.s32.totalorder %s556_s4, %s375_s22  ;;  %p379_p5 = scmp.lt.u32.totalorder %s375_s22, %s556_s4 }
  0x4a   :  { %p381_p6 = pnand %p379_p5, %p376_p4 }
  0x4c   :  { %384 = shalt.err (!%p381_p6)
}
  0x4d   :  { %s385_s27 = scalar_lea.vmem %s65_s8, 16  ;;  %s389_s28 = scalar_lea.vmem %s65_s8, 32 }
  0x4e   :  { %p386_p7 = scmp.ne.s32.totalorder %s65_s8, %s385_s27  ;;  %p390_p8 = scmp.lt.s32.totalorder %s65_s8, %s65_s8 }
  0x4f   :  { %p391_p9 = scmp.lt.s32.totalorder %s389_s28, %s385_s27 }
  0x51   :  { %p392_p10 = por %p391_p9, %p390_p8 }
  0x53   :  { %p393_p11 = pnand %p392_p10, %p386_p7 }
  0x55   :  { %396 = shalt.err (!%p393_p11)
}
  0x56   :  { %67 = dma.hbm_to_vmem [thread:$0]  %s556_s4, 16, %s65_s8, [#allocation9]  }
  0x57   :  { %419 = dma.done.wait [#allocation3], 256  }
  0x58   :  { %420 = vsyncadd [#allocation3], 4294967040 }
  0x59   :  { %421 = dma.done.wait [#allocation6], 32  }
  0x5a   :  { %422 = vsyncadd [#allocation6], 4294967264 }
  0x5b   :  { %423 = dma.done.wait [#allocation9], 528  }
  0x5c   :  { %424 = vsyncadd [#allocation9], 4294966768  ;;  %vm87_vm0 = vcmask 261120   ;;  %v83_v0 = vld [vmem:[#allocation2] sm:$0xff]  ;;  %v84_v1 = vld [vmem:[#allocation2 + $0x8] sm:$0xff]  ;;  %s434_s4 = smov [#allocation11]  }
  0x5d   :  { %v88_v2 = vsel %vm87_vm0, %v83_v0, 0.0  ;;  %v91_v3 = vsel %vm87_vm0, %v84_v1, 0.0  ;;  %v131_v14 = vld [vmem:[#allocation8] sm:$0xff]  ;;  %v132_v15 = vld [vmem:[#allocation8 + $0x8] sm:$0xff]  ;;  %v133_v16 = vld [vmem:[#allocation8 + $0x10] sm:$0xff]  ;;  %s231_s29 = sshll.u32 %s434_s4, 4  ;;  %s232_s29 = int_to_ptr.vmem [resolvable:$true] %s231_s29 }
  0x5e   :  { %89 = vadd.xlane.f32.xlu0 %v88_v2  ;;  %v267_v17 = vpack.c.bf16 %v132_v15, %v131_v14  ;;  %v134_v18 = vld [vmem:[#allocation8 + $0x18] sm:$0xff]  ;;  %v247_v36 = vld [vmem:[#allocation10] ss:$0 sm:$0xff]  ;;  %vm223_vm1 = vcmask 785408   ;;  %s397_s30 = scalar_lea.vmem %s232_s29, 256  ;;  %p402_p13 = scmp.lt.s32.totalorder %s232_s29, %s232_s29 }
  0x5f   :  { %v271_v19 = vpack.c.bf16 %v134_v18, %v133_v16  ;;  %v245_v27 = vld [vmem:[#allocation5] ss:$0 sm:$0xff]  ;;  %v246_v29 = vld [vmem:[#allocation7] ss:$0 sm:$0xff]  ;;  %p398_p12 = scmp.ne.s32.totalorder %s232_s29, %s397_s30  ;;  %p403_p0 = scmp.lt.s32.totalorder %s397_s30, %s397_s30 }
  0x60   :  { %268 = vmatprep.subr.bf16.mxu0 %v267_v17 }
  0x61   :  { %270 = vmatpush3.bf16.msra.mxu0 %v267_v17  ;;  %p404_p1 = por %p403_p0, %p402_p13 }
  0x62   :  { %92 = vadd.xlane.f32.xlu0 %v91_v3  ;;  %272 = vmatprep.subr.bf16.mxu0 %v271_v19 }
  0x63   :  { %p405_p2 = pnand %p404_p1, %p398_p12 }
  0x65   :  { %274 = vmatpush3.bf16.msra.mxu0 %v271_v19 }
  0xeb   :  { %v90_v4 = vpop.xlane.xlu0 %89 }
  0xec   :  { %v95_v5 = vmul.f32 0.03125, %v90_v4 }
  0xee   :  { %v97_v6 = vsub.f32 %v83_v0, %v95_v5 }
  0xef   :  { %v93_v7 = vpop.xlane.xlu0 %92 }
  0xf0   :  { %v96_v8 = vmul.f32 0.03125, %v93_v7  ;;  %v99_v9 = vmul.f32 %v97_v6, %v97_v6 }
  0xf2   :  { %v98_v10 = vsub.f32 %v84_v1, %v96_v8  ;;  %v101_v11 = vsel %vm87_vm0, %v99_v9, 0.0 }
  0xf3   :  { %102 = vadd.xlane.f32.xlu1 %v101_v11 }
  0xf4   :  { %v100_v12 = vmul.f32 %v98_v10, %v98_v10 }
  0xf6   :  { %v104_v13 = vsel %vm87_vm0, %v100_v12, 0.0 }
  0xf7   :  { %105 = vadd.xlane.f32.xlu1 %v104_v13 }
 0x180   :  { %v103_v20 = vpop.xlane.xlu1 %102 }
 0x181   :  { %v107_v21 = vmul.f32 0.03125, %v103_v20 }
 0x183   :  { %v109_v22 = vadd.f32 1e-05, %v107_v21 }
 0x184   :  { %v106_v23 = vpop.xlane.xlu1 %105 }
 0x185   :  { %283 = vrsqrt.f32 %v109_v22  ;;  %v108_v24 = vmul.f32 0.03125, %v106_v23 }
 0x187   :  { %v110_v25 = vadd.f32 1e-05, %v108_v24 }
 0x189   :  { %285 = vrsqrt.f32 %v110_v25 }
 0x18f   :  { %v284_v26 = vpop.eup %283 }
 0x190   :  { %v113_v28 = vmul.f32 %v284_v26, %v97_v6 }
 0x192   :  { %v121_v30 = vmul.f32 %v245_v27, %v113_v28 }
 0x193   :  { %v286_v31 = vpop.eup %285 }
 0x194   :  { %v114_v32 = vmul.f32 %v286_v31, %v98_v10  ;;  %v129_v33 = vadd.f32 %v246_v29, %v121_v30 }
 0x196   :  { %v122_v34 = vmul.f32 %v245_v27, %v114_v32  ;;  %264 = vmatprep.mubr.msk.f32.mxu0 %vm87_vm0, %v129_v33 }
 0x198   :  { %v130_v35 = vadd.f32 %v246_v29, %v122_v34 }
 0x19a   :  { %265 = vmatmul.mubr.msk.f32.vlgmr.msra.gmra.mrb[0].mxu0 %vm87_vm0, %v130_v35 }
 0x26d   :  { %v266_v37 = vpop.f32.mrb[0].mxu0 }
 0x26e   :  { %v220_v38 = vadd.f32 %v266_v37, %v247_v36  ;;  %v214_v39 = vpop.f32.mrb[1].mxu0 }
 0x26f   :  { %v215_v40 = vadd.f32 %v247_v36, %v214_v39 }
 0x270   :  { %225 = vst.msk [vmem:[#allocation11 + $0x8] sm:$0xff] %vm223_vm1, %v220_v38 }
 0x271   :  { %224 = vst.msk [vmem:[#allocation11] sm:$0xff] %vm223_vm1, %v215_v40 }
 0x272   :  { %408 = shalt.err (!%p405_p2)
}
 0x273   :  { %s409_s8 = scalar_lea.hbm %s557_s5, 256 }
 0x274   :  { %p410_p3 = scmp.ne.s32.totalorder %s557_s5, %s409_s8  ;;  %p413_p4 = scmp.lt.u32.totalorder %s409_s8, %s557_s5 }
 0x276   :  { %p415_p5 = pnand %p413_p4, %p410_p3 }
 0x278   :  { %418 = shalt.err (!%p415_p5)
}
 0x279   :  { %237 = dma.vmem_to_hbm [thread:$0]  %s232_s29, 256, %s557_s5, [#allocation4], %s430_s17, %s430_s17, %s431_s18  }
 0x27a   :  { %425 = dma.done.wait [#allocation4], 256  }
 0x27b   :  { %426 = vsyncadd [#allocation4], 4294967040 }
 0x27c   :  { %241 = vsyncpa [#allocation3], 1 }
 0x27d   :  { %242 = vsyncpa [#allocation6], 1 }
 0x27e   :  { %243 = vsyncpa [#allocation9], 1 }
 0x27f   :  { %244 = vsyncpa [#allocation4], 1 }

</bundles_post_ra>
